<compile_context>
chip_gen: v7x
topology: tpu7x:2x2x1
jax: 0.10.0
libtpu: 0.0.40
codegen_flags: <defaults>
</compile_context>

<pallas_src>
import jax
import jax.numpy as jnp
from jax import lax
from jax.experimental import pallas as pl
from jax.experimental.pallas import tpu as pltpu


_VMEM_BUDGET = 40 * 1024 * 1024   # working-set budget (fits v7x 64 MiB physical)
_VMEM_LIMIT = 48 * 1024 * 1024    # scoped VMEM limit handed to Mosaic


def _round_up(x, m):
    return (x + m - 1) // m * m


def _pad2(a, rows, cols):
    pr, pc = rows - a.shape[0], cols - a.shape[1]
    if pr or pc:
        a = jnp.pad(a, ((0, pr), (0, pc)))
    return a


# --------------------- fused path: resident W, no K grid ---------------------

def _fused_kernel(x_ref, w_ref, b_ref, y_ref, o_ref):
    # x_ref: (tm, Hp) f32   w_ref: (Hp, Hp) (out, in) layout, bf16 or f32
    # b_ref: (1, Hp) f32    y_ref/o_ref: (tm, Hp)
    x = x_ref[...]
    # X @ W^T == contract dim 1 of X with dim 1 of W (PyTorch layout, no .T copy).
    z = lax.dot_general(
        x.astype(w_ref.dtype), w_ref[...],
        dimension_numbers=(((1,), (1,)), ((), ())),
        preferred_element_type=jnp.float32)
    t = jax.nn.sigmoid(z + b_ref[...])            # f32 gate (EUP exp + VPU)
    xf = x.astype(jnp.float32)
    yf = y_ref[...].astype(jnp.float32)
    o_ref[...] = (yf + t * (xf - yf)).astype(o_ref.dtype)


def _fused_call(xp, yp, wp, bp, tm, out_dtype, cost):
    Bp, Hp = xp.shape
    return pl.pallas_call(
        _fused_kernel,
        out_shape=jax.ShapeDtypeStruct((Bp, Hp), out_dtype),
        grid_spec=pltpu.PrefetchScalarGridSpec(
            num_scalar_prefetch=0,
            grid=(Bp // tm,),
            in_specs=[
                pl.BlockSpec((tm, Hp), lambda i: (i, 0)),   # X (single stream)
                pl.BlockSpec((Hp, Hp), lambda i: (0, 0)),   # W resident, (out, in)
                pl.BlockSpec((1, Hp), lambda i: (0, 0)),    # bias
                pl.BlockSpec((tm, Hp), lambda i: (i, 0)),   # Y
            ],
            out_specs=pl.BlockSpec((tm, Hp), lambda i: (i, 0)),
        ),
        compiler_params=pltpu.CompilerParams(
            dimension_semantics=("parallel",),
            vmem_limit_bytes=_VMEM_LIMIT),
        cost_estimate=cost,
    )(xp, wp, bp, yp)


# ------------------ fallback path: K-tiled accumulation ---------------------

def _tiled_kernel(xk_ref, w_ref, b_ref, x_ref, y_ref, o_ref, acc_ref):
    k = pl.program_id(2)

    @pl.when(k == 0)
    def _():
        acc_ref[...] = jnp.zeros_like(acc_ref)

    acc_ref[...] += lax.dot_general(
        xk_ref[...].astype(w_ref.dtype), w_ref[...],
        dimension_numbers=(((1,), (1,)), ((), ())),
        preferred_element_type=jnp.float32)

    @pl.when(k == pl.num_programs(2) - 1)
    def _():
        t = jax.nn.sigmoid(acc_ref[...] + b_ref[...])    # bias added exactly once
        xf = x_ref[...].astype(jnp.float32)
        yf = y_ref[...].astype(jnp.float32)
        o_ref[...] = (yf + t * (xf - yf)).astype(o_ref.dtype)


def _tiled_call(xp, yp, wp, bp, tm, tn, tk, out_dtype, cost):
    Bp, Hp = xp.shape
    return pl.pallas_call(
        _tiled_kernel,
        out_shape=jax.ShapeDtypeStruct((Bp, Hp), out_dtype),
        grid_spec=pltpu.PrefetchScalarGridSpec(
            num_scalar_prefetch=0,
            grid=(Bp // tm, Hp // tn, Hp // tk),
            in_specs=[
                pl.BlockSpec((tm, tk), lambda i, j, k: (i, k)),   # X (matmul)
                pl.BlockSpec((tn, tk), lambda i, j, k: (j, k)),   # W (out, in)
                pl.BlockSpec((1, tn), lambda i, j, k: (0, j)),    # bias
                pl.BlockSpec((tm, tn), lambda i, j, k: (i, j)),   # X (elementwise)
                pl.BlockSpec((tm, tn), lambda i, j, k: (i, j)),   # Y
            ],
            out_specs=pl.BlockSpec((tm, tn), lambda i, j, k: (i, j)),
            scratch_shapes=[pltpu.VMEM((tm, tn), jnp.float32)],
        ),
        compiler_params=pltpu.CompilerParams(
            dimension_semantics=("parallel", "parallel", "arbitrary"),
            vmem_limit_bytes=_VMEM_LIMIT),
        cost_estimate=cost,
    )(xp, wp, bp, xp, yp)


# --------------------------------- wrapper -----------------------------------

def residual_block(x, y, weight, bias, *, use_bf16_matmul=True,
                   force_tiled=False, tile_override=None):
    """x, y: (B, H). weight: (H, H) PyTorch layout (out, in). bias: (H,)."""
    B, H = x.shape
    assert y.shape == (B, H)
    assert weight.shape == (H, H)
    assert bias.shape == (H,)

    out_dtype = x.dtype
    Hp = _round_up(H, 128)
    Bp = _round_up(B, 8)

    # bf16 weight operand by default: halves the dominant HBM stream on all
    # generations; gate math / accumulation stay f32.
    # TODO(synk): on v7x an fp8 weight operand would halve W traffic again.
    w_dtype = jnp.bfloat16 if use_bf16_matmul else weight.dtype
    wb = jnp.dtype(w_dtype).itemsize
    ob = jnp.dtype(out_dtype).itemsize

    cost = pl.CostEstimate(
        flops=2 * B * H * H + 4 * B * H,
        transcendentals=B * H,
        bytes_accessed=int(Hp * Hp * wb + Bp * Hp * (4 + 4 + ob) + Hp * 4))

    # ----- plan selection: resident-W fused path if the working set fits -----
    def fused_vmem_bytes(tm_):
        # W (x2 default double buffer) + double-buffered X/Y/out tiles + bias.
        return (2 * Hp * Hp * wb
                + 2 * tm_ * Hp * (4 + 4 + ob)
                + 2 * 8 * Hp * 4)

    tm = max(8, min(256, Bp))
    while tm > 8 and fused_vmem_bytes(tm) > _VMEM_BUDGET:
        tm = max(8, _round_up(tm // 2, 8))
    use_fused = (not force_tiled) and fused_vmem_bytes(tm) <= _VMEM_BUDGET

    if not use_fused:
        if tile_override is not None:
            tm, tn, tk = tile_override
        else:
            tn = 512 if Hp % 512 == 0 else (256 if Hp % 256 == 0 else 128)
            tk = tn
            tm = max(8, min(256, Bp))
    Bp = _round_up(Bp, tm)

    xp = _pad2(x, Bp, Hp).astype(jnp.float32)
    yp = _pad2(y, Bp, Hp).astype(jnp.float32)
    wp = _pad2(weight, Hp, Hp).astype(w_dtype)            # stays (out, in) layout
    bp = jnp.pad(bias, (0, Hp - H)).astype(jnp.float32).reshape(1, Hp)

    if use_fused:
        out = _fused_call(xp, yp, wp, bp, tm, out_dtype, cost)
    else:
        out = _tiled_call(xp, yp, wp, bp, tm, tn, tk, out_dtype, cost)
    return out[:B, :H]


def reference(x, y, weight, bias):
    t = jax.nn.sigmoid(x @ weight.T + bias)
    return x * t + y * (1.0 - t)


# TODO(synk): DropConnect training-mode Bernoulli weight masking is not
# implemented (module forward in eval mode is a plain Linear, which is what
# this kernel computes).


if __name__ == "__main__":
    key = jax.random.PRNGKey(0)

    def make_case(key, batch, hidden):
        k_x, k_y, k_w, k_b = jax.random.split(key, 4)
        x = jax.random.normal(k_x, (batch, hidden), dtype=jnp.float32)
        y = jax.random.normal(k_y, (batch, hidden), dtype=jnp.float32)
        bound = 1.0 / (hidden ** 0.5)   # PyTorch-style U(-1/sqrt(H), 1/sqrt(H))
        w = jax.random.uniform(k_w, (hidden, hidden), jnp.float32, -bound, bound)
        b = jax.random.uniform(k_b, (hidden,), jnp.float32, -bound, bound)
        return x, y, w, b

    k1, k2 = jax.random.split(key)

    # Case 1: small module-sized shapes (padded to lane width), exact f32 path.
    x, y, w, b = make_case(k1, batch=8, hidden=32)
    ref = reference(x, y, w, b)
    out = jax.block_until_ready(residual_block(x, y, w, b, use_bf16_matmul=False))
    assert out.shape == ref.shape
    assert jnp.allclose(out, ref, atol=1e-5, rtol=1e-5), "mismatch (8, 32) f32"

    # Case 1b: default bf16-weight operand on the tiny case.
    out = jax.block_until_ready(residual_block(x, y, w, b))
    assert jnp.allclose(out, ref, atol=1e-2, rtol=1e-2), "mismatch (8, 32) bf16"

    # Case 2: multi-lane fused resident-W path (default bf16 operands + f32 check).
    x, y, w, b = make_case(k2, batch=16, hidden=512)
    ref = reference(x, y, w, b)
    out = jax.block_until_ready(residual_block(x, y, w, b))
    assert jnp.allclose(out, ref, atol=2e-2, rtol=2e-2), "mismatch (16, 512) bf16"
    out32 = jax.block_until_ready(residual_block(x, y, w, b, use_bf16_matmul=False))
    assert jnp.allclose(out32, ref, atol=1e-5, rtol=1e-5), "mismatch (16, 512) f32"

    # Case 3: force the K-tiled fallback (exercises the accumulator across K).
    out_t = jax.block_until_ready(
        residual_block(x, y, w, b, use_bf16_matmul=False,
                       force_tiled=True, tile_override=(16, 128, 128)))
    assert jnp.allclose(out_t, ref, atol=1e-5, rtol=1e-5), "mismatch tiled fallback"

    print("KERNEL_OK")
</pallas_src>

<mosaic_0001>
module attributes {stable_mosaic.version = 11 : i64} {
  func.func @_fused_kernel(%arg0: i32, %arg1: memref<8x128xf32, #tpu.memory_space<vmem>>, %arg2: memref<128x128xf32, #tpu.memory_space<vmem>>, %arg3: memref<1x128xf32, #tpu.memory_space<vmem>>, %arg4: memref<8x128xf32, #tpu.memory_space<vmem>>, %arg5: memref<8x128xf32, #tpu.memory_space<vmem>>) attributes {dimension_semantics = [#tpu.dimension_semantics<parallel>], iteration_bounds = array<i64: 1>, scalar_prefetch = 0 : i64, scratch_operands = 0 : i64, tpu.core_type = #tpu.core_type<tc>, window_params = [{transform_indices = @transform_0, window_bounds = array<i64: 8, 128>}, {pipeline_mode = #tpu.pipeline_mode<synchronous>, transform_indices = @transform_1, window_bounds = array<i64: 128, 128>}, {pipeline_mode = #tpu.pipeline_mode<synchronous>, transform_indices = @transform_2, window_bounds = array<i64: 1, 128>}, {transform_indices = @transform_3, window_bounds = array<i64: 8, 128>}, {transform_indices = @transform_4, window_bounds = array<i64: 8, 128>}]} {
    %c0 = arith.constant 0 : index
    %c0_0 = arith.constant 0 : index
    %0 = vector.load %arg1[%c0, %c0_0] : memref<8x128xf32, #tpu.memory_space<vmem>>, vector<8x128xf32>
    %c0_1 = arith.constant 0 : index
    %c0_2 = arith.constant 0 : index
    %1 = vector.load %arg2[%c0_1, %c0_2] : memref<128x128xf32, #tpu.memory_space<vmem>>, vector<128x128xf32>
    %cst = arith.constant dense<0.000000e+00> : vector<8x128xf32>
    %2 = tpu.matmul %0, %1, %cst {dimension_numbers = #tpu.dot_dimension_numbers<[1], [1], [0], [0], [0, 0, 1, 0], [], []>} : vector<8x128xf32>, vector<128x128xf32>, vector<8x128xf32> -> vector<8x128xf32>
    %c0_3 = arith.constant 0 : index
    %c0_4 = arith.constant 0 : index
    %3 = vector.load %arg3[%c0_3, %c0_4] : memref<1x128xf32, #tpu.memory_space<vmem>>, vector<1x128xf32>
    %4 = vector.broadcast %3 : vector<1x128xf32> to vector<8x128xf32>
    %5 = arith.addf %2, %4 : vector<8x128xf32>
    %6 = arith.negf %5 : vector<8x128xf32>
    %7 = math.exp %6 : vector<8x128xf32>
    %cst_5 = arith.constant 1.000000e+00 : f32
    %8 = vector.broadcast %cst_5 : f32 to vector<8x128xf32>
    %9 = arith.addf %8, %7 : vector<8x128xf32>
    %10 = arith.divf %8, %9 : vector<8x128xf32>
    %c0_6 = arith.constant 0 : index
    %c0_7 = arith.constant 0 : index
    %11 = vector.load %arg4[%c0_6, %c0_7] : memref<8x128xf32, #tpu.memory_space<vmem>>, vector<8x128xf32>
    %12 = arith.subf %0, %11 : vector<8x128xf32>
    %13 = arith.mulf %10, %12 : vector<8x128xf32>
    %14 = arith.addf %11, %13 : vector<8x128xf32>
    %c0_8 = arith.constant 0 : index
    %c0_9 = arith.constant 0 : index
    %15 = vector.load %arg5[%c0_8, %c0_9] : memref<8x128xf32, #tpu.memory_space<vmem>>, vector<8x128xf32>
    tpu.vector_store %arg5[%c0_8, %c0_9], %14 {strides = array<i32>} : memref<8x128xf32, #tpu.memory_space<vmem>>, vector<8x128xf32>,
    return
  }
  func.func @transform_0(%arg0: i32) -> (i32, i32) {
    %c0_i32 = arith.constant 0 : i32
    %c0_i32_0 = arith.constant 0 : i32
    return %arg0, %c0_i32 : i32, i32
  }
  func.func @transform_1(%arg0: i32) -> (i32, i32) {
    %c0_i32 = arith.constant 0 : i32
    %c0_i32_0 = arith.constant 0 : i32
    %c0_i32_1 = arith.constant 0 : i32
    return %c0_i32, %c0_i32_0 : i32, i32
  }
  func.func @transform_2(%arg0: i32) -> (i32, i32) {
    %c0_i32 = arith.constant 0 : i32
    %c0_i32_0 = arith.constant 0 : i32
    %c0_i32_1 = arith.constant 0 : i32
    return %c0_i32, %c0_i32_0 : i32, i32
  }
  func.func @transform_3(%arg0: i32) -> (i32, i32) {
    %c0_i32 = arith.constant 0 : i32
    %c0_i32_0 = arith.constant 0 : i32
    return %arg0, %c0_i32 : i32, i32
  }
  func.func @transform_4(%arg0: i32) -> (i32, i32) {
    %c0_i32 = arith.constant 0 : i32
    %c0_i32_0 = arith.constant 0 : i32
    return %arg0, %c0_i32 : i32, i32
  }
}

</mosaic_0001>

<bundles_post_ra>
// kernel: tpu_custom_call.1
= control target key start
LH: loop header
LB: loop body
LE: loop exit
PB: predicated region body
PF: predicated region fallthrough
CT: control target
= control target key end

     0   :  { %9 = vsyncpa [#allocation3], 0  ;;  %s409_s0 = inlined_call_operand.hbm [shape: f32[8,128], index: 0, kind: input, shape index: {}]   ;;  %s410_s1 = inlined_call_operand.hbm [shape: f32[128,128], index: 1, kind: input, shape index: {}]   ;;  %s411_s2 = inlined_call_operand.vmem [shape: f32[1,128], index: 2, kind: input, shape index: {}]   ;;  %s412_s3 = inlined_call_operand.vmem [shape: f32[8,128], index: 3, kind: input, shape index: {}]   ;;  %s413_s4 = inlined_call_operand.hbm [shape: f32[8,128], index: 4, kind: output, shape index: {}]  }
   0x1   :  { %10 = vsyncpa [#allocation6], 0 }
   0x2   :  { %11 = vsyncpa [#allocation4], 0  ;;  %s327_s15 = smov [#allocation2]   ;;  %s328_s17 = smov [#allocation5]  }
   0x3   :  { %s18_s16 = sshll.u32 %s327_s15, 4  ;;  %s27_s18 = sshll.u32 %s328_s17, 4  ;;  %s19_s16 = int_to_ptr.vmem [resolvable:$true] %s18_s16  ;;  %s360_s18 = int_to_ptr.vmem [resolvable:$true] %s27_s18 }
   0x4   :  { %s255_s21 = scalar_lea.hbm %s409_s0, 128 }
   0x5   :  { %p256_p0 = scmp.ne.s32.totalorder %s409_s0, %s255_s21  ;;  %p259_p1 = scmp.lt.u32.totalorder %s255_s21, %s409_s0 }
   0x7   :  { %p261_p2 = pnand %p259_p1, %p256_p0 }
   0x9   :  { %264 = shalt.err (!%p261_p2)
}
   0xa   :  { %s265_s26 = scalar_lea.vmem %s19_s16, 128  ;;  %p270_p4 = scmp.lt.s32.totalorder %s19_s16, %s19_s16 }
   0xb   :  { %p266_p3 = scmp.ne.s32.totalorder %s19_s16, %s265_s26  ;;  %p271_p5 = scmp.lt.s32.totalorder %s265_s26, %s265_s26 }
   0xd   :  { %p272_p6 = por %p271_p5, %p270_p4 }
   0xf   :  { %p273_p7 = pnand %p272_p6, %p266_p3 }
  0x11   :  { %276 = shalt.err (!%p273_p7)
}
  0x12   :  { %21 = dma.hbm_to_vmem [thread:$0]  %s409_s0, 128, %s19_s16, [#allocation3]  }
  0x13   :  { %s277_s5 = scalar_lea.hbm %s410_s1, 2048 }
  0x14   :  { %p278_p8 = scmp.ne.s32.totalorder %s410_s1, %s277_s5  ;;  %p281_p9 = scmp.lt.u32.totalorder %s277_s5, %s410_s1 }
  0x16   :  { %p283_p10 = pnand %p281_p9, %p278_p8 }
  0x18   :  { %286 = shalt.err (!%p283_p10)
}
  0x19   :  { %s287_s10 = scalar_lea.vmem %s360_s18, 2048  ;;  %p292_p12 = scmp.lt.s32.totalorder %s360_s18, %s360_s18 }
  0x1a   :  { %p288_p11 = scmp.ne.s32.totalorder %s360_s18, %s287_s10  ;;  %p293_p13 = scmp.lt.s32.totalorder %s287_s10, %s287_s10 }
  0x1c   :  { %p294_p0 = por %p293_p13, %p292_p12 }
  0x1e   :  { %p295_p1 = pnand %p294_p0, %p288_p11 }
  0x20   :  { %298 = shalt.err (!%p295_p1)
}
  0x21   :  { %s329_s0 = smov 128   ;;  %s330_s11 = smov 8  }
  0x22   :  { %33 = dma.hbm_to_vmem [thread:$0]  %s410_s1, 2048, %s360_s18, [#allocation6], %s329_s0, %s329_s0, %s330_s11  }
  0x23   :  { %321 = dma.done.wait [#allocation3], 128  }
  0x24   :  { %322 = vsyncadd [#allocation3], 4294967168 }
  0x25   :  { %323 = dma.done.wait [#allocation6], 2048  }
  0x26   :  { %324 = vsyncadd [#allocation6], 4294965248  ;;  %v331_v0 = vmov 0.0|0.0   ;;  %vm332_vm0 = vmmov 0   ;;  %v333_v1 = vmov 0.0   ;;  %v45_v2 = vld [vmem:[#allocation5] sm:$0xff] }
  0x27   :  { %219 = vmatprep.subr.bf16.mxu0 %v331_v0  ;;  %216 = vmatprep.mubr.msk.f32.mxu0 %vm332_vm0, %v333_v1  ;;  %v46_v3 = vld [vmem:[#allocation5 + $0x8] sm:$0xff]  ;;  %v47_v5 = vld [vmem:[#allocation5 + $0x10] sm:$0xff]  ;;  %v48_v6 = vld [vmem:[#allocation5 + $0x18] sm:$0xff]  ;;  %s334_s17 = smov [#allocation7]  }
  0x28   :  { %v220_v4 = vpack.c.bf16 %v46_v3, %v45_v2  ;;  %v223_v7 = vpack.c.bf16 %v48_v6, %v47_v5  ;;  %v49_v8 = vld [vmem:[#allocation5 + $0x20] sm:$0xff]  ;;  %v50_v9 = vld [vmem:[#allocation5 + $0x28] sm:$0xff]  ;;  %v51_v11 = vld [vmem:[#allocation5 + $0x30] sm:$0xff]  ;;  %s155_s18 = sshll.u32 %s334_s17, 4  ;;  %s156_s18 = int_to_ptr.vmem [resolvable:$true] %s155_s18 }
  0x29   :  { %v226_v10 = vpack.c.bf16 %v50_v9, %v49_v8  ;;  %v52_v12 = vld [vmem:[#allocation5 + $0x38] sm:$0xff]  ;;  %v53_v14 = vld [vmem:[#allocation5 + $0x40] sm:$0xff]  ;;  %v54_v15 = vld [vmem:[#allocation5 + $0x48] sm:$0xff]  ;;  %p304_p3 = scmp.lt.s32.totalorder %s156_s18, %s156_s18 }
  0x2a   :  { %221 = vmatpush3.bf16.xpose.msra.mxu0 %v220_v4  ;;  %v229_v13 = vpack.c.bf16 %v52_v12, %v51_v11  ;;  %v232_v16 = vpack.c.bf16 %v54_v15, %v53_v14  ;;  %v55_v17 = vld [vmem:[#allocation5 + $0x50] sm:$0xff]  ;;  %v56_v18 = vld [vmem:[#allocation5 + $0x58] sm:$0xff]  ;;  %v57_v20 = vld [vmem:[#allocation5 + $0x60] sm:$0xff] }
  0x2b   :  { %222 = vmatprep.subr.bf16.mxu0 %v331_v0  ;;  %v235_v19 = vpack.c.bf16 %v56_v18, %v55_v17  ;;  %v58_v21 = vld [vmem:[#allocation5 + $0x68] sm:$0xff]  ;;  %v59_v23 = vld [vmem:[#allocation5 + $0x70] sm:$0xff]  ;;  %v60_v24 = vld [vmem:[#allocation5 + $0x78] sm:$0xff] }
  0x2c   :  { %v238_v22 = vpack.c.bf16 %v58_v21, %v57_v20  ;;  %v241_v25 = vpack.c.bf16 %v60_v24, %v59_v23  ;;  %v44_v26 = vld [vmem:[#allocation2] sm:$0xff] }
  0x2d   :  { %v165_v27 = vld [vmem:[%s411_s2] ss:$0 sm:$0xff]  ;;  %s299_s2 = scalar_lea.vmem %s156_s18, 128 }
  0x2e   :  { %v144_v34 = vld [vmem:[%s412_s3] sm:$0xff]  ;;  %p300_p2 = scmp.ne.s32.totalorder %s156_s18, %s299_s2  ;;  %p305_p4 = scmp.lt.s32.totalorder %s299_s2, %s299_s2 }
  0x2f   :  { %v145_v35 = vsub.f32 %v44_v26, %v144_v34 }
  0x30   :  { %p306_p5 = por %p305_p4, %p304_p3 }
  0x32   :  { %224 = vmatpush3.bf16.xpose.msra.mxu0 %v223_v7  ;;  %p307_p6 = pnand %p306_p5, %p300_p2 }
  0x33   :  { %225 = vmatprep.subr.bf16.mxu0 %v331_v0 }
  0x3a   :  { %227 = vmatpush3.bf16.xpose.msra.mxu0 %v226_v10 }
  0x3b   :  { %228 = vmatprep.subr.bf16.mxu0 %v331_v0 }
  0x42   :  { %230 = vmatpush3.bf16.xpose.msra.mxu0 %v229_v13 }
  0x43   :  { %231 = vmatprep.subr.bf16.mxu0 %v331_v0 }
  0x4a   :  { %233 = vmatpush3.bf16.xpose.msra.mxu0 %v232_v16 }
  0x4b   :  { %234 = vmatprep.subr.bf16.mxu0 %v331_v0 }
  0x52   :  { %236 = vmatpush3.bf16.xpose.msra.mxu0 %v235_v19 }
  0x53   :  { %237 = vmatprep.subr.bf16.mxu0 %v331_v0 }
  0x5a   :  { %239 = vmatpush3.bf16.xpose.msra.mxu0 %v238_v22 }
  0x5b   :  { %240 = vmatprep.subr.bf16.mxu0 %v331_v0 }
  0x62   :  { %242 = vmatpush3.bf16.xpose.msra.mxu0 %v241_v25 }
  0x69   :  { %217 = vmatmul.mubr.f32.vlgmr.msra.gmra.mrb[0].mxu0 %v44_v26 }
 0x13c   :  { %v134_v28 = vpop.f32.mrb[0].mxu0 }
 0x13d   :  { %v135_v29 = vadd.f32 %v165_v27, %v134_v28  ;;  %v218_v30 = vpop.f32.mrb[1].mxu0 }
 0x13f   :  { %v166_v31 = vmul.f32 -1.442695, %v135_v29 }
 0x141   :  { %251 = vpow2.f32 %v166_v31 }
 0x14b   :  { %v252_v32 = vpop.eup %251 }
 0x14c   :  { %v141_v33 = vadd.f32 1.0, %v252_v32 }
 0x14e   :  { %253 = vrcp.f32 %v141_v33 }
 0x158   :  { %v254_v36 = vpop.eup %253 }
 0x159   :  { %v146_v37 = vmul.f32 %v254_v36, %v145_v35 }
 0x15b   :  { %v147_v38 = vadd.f32 %v146_v37, %v144_v34 }
 0x15d   :  { %148 = vst [vmem:[#allocation7] sm:$0xff] %v147_v38 }
 0x15e   :  { %310 = shalt.err (!%p307_p6)
}
 0x15f   :  { %s311_s21 = scalar_lea.hbm %s413_s4, 128 }
 0x160   :  { %p312_p7 = scmp.ne.s32.totalorder %s413_s4, %s311_s21  ;;  %p315_p8 = scmp.lt.u32.totalorder %s311_s21, %s413_s4 }
 0x162   :  { %p317_p9 = pnand %p315_p8, %p312_p7 }
 0x164   :  { %320 = shalt.err (!%p317_p9)
}
 0x165   :  { %158 = dma.vmem_to_hbm [thread:$0]  %s156_s18, 128, %s413_s4, [#allocation4]  }
 0x166   :  { %325 = dma.done.wait [#allocation4], 128  }
 0x167   :  { %326 = vsyncadd [#allocation4], 4294967168 }
 0x168   :  { %162 = vsyncpa [#allocation3], 1 }
 0x169   :  { %163 = vsyncpa [#allocation6], 1 }
 0x16a   :  { %164 = vsyncpa [#allocation4], 1 }

</bundles_post_ra>
